<compile_context>
chip_gen: v6e
topology: v6e:2x2x1
jax: 0.10.0
libtpu: 0.0.40
codegen_flags: <defaults>
</compile_context>

<pallas_src>
import math

import jax
import jax.numpy as jnp
import numpy as np
from jax.experimental import pallas as pl
from jax.experimental.pallas import tpu as pltpu

_MASK_VALUE = -1e30  # large finite negative: avoids (-inf) - (-inf) NaNs


# --------------------------------- kernels -----------------------------------

def qkv_head_proj_kernel(x_ref, w_ref, b_ref, q_ref, k_ref, v_ref):
    """Per-head fused QKV projection, emitting head-major (H, tq, hd) blocks.

    x_ref: (tq, C)  w_ref: (H, C, 3*hd) resident bf16  b_ref: (H, 1, 3*hd) f32
    q/k/v_ref: (H, tq, hd) bf16 output blocks of (B, H, T, hd) arrays.
    The attention scale is already folded into the Q columns of w_ref/b_ref.
    """
    x = x_ref[...].astype(jnp.bfloat16)                    # (tq, C)
    n_head, _, three_hd = w_ref.shape
    hd = three_hd // 3
    for h in range(n_head):
        acc = jnp.dot(x, w_ref[h], preferred_element_type=jnp.float32)
        acc = acc + b_ref[h]                               # (tq, 3*hd) f32
        q_ref[h] = acc[:, :hd].astype(q_ref.dtype)
        k_ref[h] = acc[:, hd:2 * hd].astype(k_ref.dtype)
        v_ref[h] = acc[:, 2 * hd:].astype(v_ref.dtype)


def flash_attn_kernel(q_ref, k_ref, v_ref, wo_ref, bo_ref, o_ref,
                      m_sc, l_sc, acc_sc):
    """One (q-tile, kv-tile) step of causal flash attention + fused c_proj.

    q_ref: (H, tq, hd)   k_ref / v_ref: (H, tkv, hd)   wo_ref: (H, hd, C)
    Scratch: m/l (H, tq, 1) f32, acc (H, tq, hd) f32.
    o_ref: (tq, C), written on the last KV step.
    """
    qi = pl.program_id(1)
    ki = pl.program_id(2)
    nkv = pl.num_programs(2)

    n_head, tq, hd = q_ref.shape
    tkv = k_ref.shape[1]

    first_q = qi * tq
    last_q = first_q + tq - 1
    first_k = ki * tkv
    last_k = first_k + tkv - 1

    @pl.when(ki == 0)
    def _init():
        m_sc[...] = jnp.full_like(m_sc, _MASK_VALUE)
        l_sc[...] = jnp.zeros_like(l_sc)
        acc_sc[...] = jnp.zeros_like(acc_sc)

    def _accumulate(apply_mask):
        # Heads batched; contraction on hd (last dim of both) -> no k.T, no loop.
        s = jnp.einsum("hqd,hkd->hqk", q_ref[...], k_ref[...],
                       preferred_element_type=jnp.float32)   # (H, tq, tkv) f32
        if apply_mask:
            row = first_q + jax.lax.broadcasted_iota(jnp.int32, (tq, tkv), 0)
            col = first_k + jax.lax.broadcasted_iota(jnp.int32, (tq, tkv), 1)
            s = jnp.where((row >= col)[None, :, :], s, _MASK_VALUE)
        m_prev = m_sc[...]
        m_new = jnp.maximum(m_prev, jnp.max(s, axis=-1, keepdims=True))
        alpha = jnp.exp(m_prev - m_new)                      # f32
        p = jnp.exp(s - m_new)                               # f32 (H, tq, tkv)
        l_sc[...] = alpha * l_sc[...] + jnp.sum(p, axis=-1, keepdims=True)
        acc_sc[...] = alpha * acc_sc[...] + jnp.einsum(
            "hqk,hkd->hqd", p.astype(jnp.bfloat16), v_ref[...],
            preferred_element_type=jnp.float32)
        m_sc[...] = m_new

    # Diagonal-straddling tiles pay for masking; fully-below-diagonal tiles run
    # unmasked; fully-above-diagonal tiles do nothing (their K/V DMA is already
    # avoided by the clamped index_map).  KV block 0 is always processed and
    # always has an unmasked column per row, so the -1e30 m-init is safe.
    @pl.when(jnp.logical_and(first_k <= last_q, last_k > first_q))
    def _masked():
        _accumulate(True)

    @pl.when(last_k <= first_q)
    def _unmasked():
        _accumulate(False)

    @pl.when(ki == nkv - 1)
    def _finalize():
        # Softmax normalization on the EUP (approx reciprocal) + fused c_proj.
        # Head contributions are accumulated into one (tq, C) f32 running sum
        # (no (H, tq, C) intermediate, no H-way add of full blocks).
        out = None
        for h in range(n_head):
            inv_l = pl.reciprocal(l_sc[h], approx=True)          # (tq, 1)
            y_h = (acc_sc[h] * inv_l).astype(jnp.bfloat16)       # (tq, hd)
            contrib = jnp.dot(y_h, wo_ref[h],
                              preferred_element_type=jnp.float32)  # (tq, C)
            out = contrib if out is None else out + contrib
        o_ref[...] = (out + bo_ref[...]).astype(o_ref.dtype)


# -------------------------------- wrapper -------------------------------------

def _vmem_limit_bytes(est):
    # Default scoped VMEM is 16 MiB (v5e) / 32 MiB (v6e/v7x); raise it to fit
    # the actual block footprint, capped at v7x's 64 MiB physical VMEM.
    return int(min(max(est + (est >> 2) + (2 << 20), 32 << 20), 64 << 20))


def causal_self_attention(x, w_attn, b_attn, w_proj, b_proj, n_head,
                          *, block_q=256, block_kv=256, block_q_proj=256,
                          out_dtype=None):
    """Pallas forward pass equivalent to minGPT CausalSelfAttention.

    x: (B, T, C); w_attn: (C, 3C) = c_attn.weight.T; b_attn: (3C,);
    w_proj: (C, C) = c_proj.weight.T; b_proj: (C,).
    """
    B, T, C = x.shape
    assert C % n_head == 0
    hd = C // n_head
    out_dtype = x.dtype if out_dtype is None else out_dtype

    tq = min(block_q, T)
    tkv = min(block_kv, T)
    tqp = min(block_q_proj, T)
    assert T % tq == 0 and T % tkv == 0 and T % tqp == 0, \
        "T must be divisible by the tile sizes"
    nq, nkv, nqp = T // tq, T // tkv, T // tqp

    # ---- one-time (host/XLA) weight prep: fold the attention scale into the
    #      Q projection and rearrange c_attn weights head-major -------------
    scale = 1.0 / math.sqrt(hd)
    wq = (w_attn[:, :C] * scale).reshape(C, n_head, hd)
    wk = w_attn[:, C:2 * C].reshape(C, n_head, hd)
    wv = w_attn[:, 2 * C:].reshape(C, n_head, hd)
    w3 = jnp.transpose(jnp.concatenate([wq, wk, wv], axis=-1),
                       (1, 0, 2)).astype(jnp.bfloat16)        # (H, C, 3*hd)
    bq = (b_attn[:C] * scale).reshape(n_head, 1, hd)
    bk = b_attn[C:2 * C].reshape(n_head, 1, hd)
    bv = b_attn[2 * C:].reshape(n_head, 1, hd)
    b3 = jnp.concatenate([bq, bk, bv], axis=-1).astype(jnp.float32)  # (H,1,3hd)

    wo = w_proj.reshape(n_head, hd, C).astype(jnp.bfloat16)   # per-head c_proj
    bo = b_proj.reshape(1, C).astype(jnp.float32)

    # TODO(synk): for very large C (>~2000) the resident (H, C, 3hd) bf16 weight
    # should be tiled along C with an f32 accumulator instead of kept whole.

    # ---- kernel 1: fused QKV projection, head-major outputs (no XLA glue) ----
    est1 = (2 * (3 * C * C * 2) + 2 * (tqp * C * 4)
            + 6 * (tqp * C * 2) + 2 * (3 * C * 4) + (1 << 20))
    q, k, v = pl.pallas_call(
        qkv_head_proj_kernel,
        grid=(B, nqp),
        in_specs=[
            pl.BlockSpec((None, tqp, C), lambda b, i: (b, i, 0)),
            pl.BlockSpec((n_head, C, 3 * hd), lambda b, i: (0, 0, 0)),
            pl.BlockSpec((n_head, 1, 3 * hd), lambda b, i: (0, 0, 0)),
        ],
        out_specs=(
            pl.BlockSpec((None, n_head, tqp, hd), lambda b, i: (b, 0, i, 0)),
            pl.BlockSpec((None, n_head, tqp, hd), lambda b, i: (b, 0, i, 0)),
            pl.BlockSpec((None, n_head, tqp, hd), lambda b, i: (b, 0, i, 0)),
        ),
        out_shape=(
            jax.ShapeDtypeStruct((B, n_head, T, hd), jnp.bfloat16),
            jax.ShapeDtypeStruct((B, n_head, T, hd), jnp.bfloat16),
            jax.ShapeDtypeStruct((B, n_head, T, hd), jnp.bfloat16),
        ),
        compiler_params=pltpu.CompilerParams(
            dimension_semantics=("parallel", "parallel"),
            vmem_limit_bytes=_vmem_limit_bytes(est1)),
        cost_estimate=pl.CostEstimate(
            flops=2 * B * T * C * 3 * C,
            transcendentals=0,
            bytes_accessed=B * T * C * 4 + 3 * C * C * 2 + 3 * B * T * C * 2),
    )(x, w3, b3)

    # ---- kernel 2: flash attention + fused output projection ----
    def kv_index_map(b, i, j):
        # Clamp to the last causally-needed KV block for this q tile so
        # causally-skipped steps map to the already-resident block (no DMA).
        j_last = (i * tq + tq - 1) // tkv
        return (b, 0, jnp.minimum(j, j_last), 0)

    out_bytes = jnp.dtype(out_dtype).itemsize
    est2 = (2 * (tq * C * 2) + 4 * (tkv * C * 2) + 2 * (C * C * 2)
            + 2 * (tq * C * out_bytes) + n_head * tq * (hd + 2) * 4
            + 3 * (n_head * tq * tkv * 4) + (1 << 20))
    out = pl.pallas_call(
        flash_attn_kernel,
        grid=(B, nq, nkv),
        in_specs=[
            pl.BlockSpec((None, n_head, tq, hd), lambda b, i, j: (b, 0, i, 0)),
            pl.BlockSpec((None, n_head, tkv, hd), kv_index_map),
            pl.BlockSpec((None, n_head, tkv, hd), kv_index_map),
            pl.BlockSpec((n_head, hd, C), lambda b, i, j: (0, 0, 0)),
            pl.BlockSpec((1, C), lambda b, i, j: (0, 0)),
        ],
        out_specs=pl.BlockSpec((None, tq, C), lambda b, i, j: (b, i, 0)),
        out_shape=jax.ShapeDtypeStruct((B, T, C), out_dtype),
        scratch_shapes=[
            pltpu.VMEM((n_head, tq, 1), jnp.float32),    # running max m
            pltpu.VMEM((n_head, tq, 1), jnp.float32),    # running sum l
            pltpu.VMEM((n_head, tq, hd), jnp.float32),   # output accumulator
        ],
        compiler_params=pltpu.CompilerParams(
            dimension_semantics=("parallel", "parallel", "arbitrary"),
            vmem_limit_bytes=_vmem_limit_bytes(est2)),
        cost_estimate=pl.CostEstimate(
            flops=2 * B * n_head * T * T * hd + 2 * B * T * C * C,
            transcendentals=B * n_head * T * T // 2,
            bytes_accessed=(B * T * C * 2                 # q
                            + (nq + 1) * B * T * C * 2    # causal K+V re-reads
                            + B * T * C * out_bytes + C * C * 2)),
    )(q, k, v, wo, bo)
    return out


# --------------------------- pure-JAX reference --------------------------------

def reference_attention(x, w_attn, b_attn, w_proj, b_proj, n_head):
    B, T, C = x.shape
    hd = C // n_head
    qkv = x @ w_attn + b_attn
    q, k, v = qkv[..., :C], qkv[..., C:2 * C], qkv[..., 2 * C:]
    q = q.reshape(B, T, n_head, hd).transpose(0, 2, 1, 3)
    k = k.reshape(B, T, n_head, hd).transpose(0, 2, 1, 3)
    v = v.reshape(B, T, n_head, hd).transpose(0, 2, 1, 3)
    att = jnp.einsum("bhqd,bhkd->bhqk", q, k) / math.sqrt(hd)
    mask = jnp.tril(jnp.ones((T, T), bool))
    att = jnp.where(mask, att, -jnp.inf)
    att = jax.nn.softmax(att, axis=-1)
    y = jnp.einsum("bhqk,bhkd->bhqd", att, v)
    y = y.transpose(0, 2, 1, 3).reshape(B, T, C)
    return y @ w_proj + b_proj


# ----------------------------------- main ---------------------------------------

def _run_case(key, B, T, C, n_head, block_q, block_kv, block_q_proj):
    ks = jax.random.split(key, 5)
    x = jax.random.normal(ks[0], (B, T, C), jnp.float32)
    w_attn = jax.random.normal(ks[1], (C, 3 * C), jnp.float32) * 0.1
    b_attn = jax.random.normal(ks[2], (3 * C,), jnp.float32) * 0.1
    w_proj = jax.random.normal(ks[3], (C, C), jnp.float32) * 0.1
    b_proj = jax.random.normal(ks[4], (C,), jnp.float32) * 0.1

    out = causal_self_attention(x, w_attn, b_attn, w_proj, b_proj, n_head,
                                block_q=block_q, block_kv=block_kv,
                                block_q_proj=block_q_proj)
    out = jax.block_until_ready(out)

    ref = reference_attention(x, w_attn, b_attn, w_proj, b_proj, n_head)
    np.testing.assert_allclose(np.asarray(out), np.asarray(ref),
                               rtol=2e-2, atol=2e-2)


if __name__ == "__main__":
    key = jax.random.PRNGKey(0)
    k1, k2 = jax.random.split(key)
    # Single-tile case: B=2, T=8, C=32 (n_head=4, head_dim=8).
    _run_case(k1, B=2, T=8, C=32, n_head=4,
              block_q=8, block_kv=8, block_q_proj=8)
    # Multi-tile flash path: T=16 with 8x8 q/kv tiles (exercises online softmax
    # across KV tiles, the masked + unmasked branches, causal tile skipping and
    # the clamped K/V index_map).
    _run_case(k2, B=2, T=16, C=32, n_head=4,
              block_q=8, block_kv=8, block_q_proj=8)
    print("KERNEL_OK")
</pallas_src>

<mosaic_0001>
module attributes {stable_mosaic.version = 11 : i64} {
  func.func @qkv_head_proj_kernel(%arg0: i32, %arg1: i32, %arg2: memref<1x8x32xf32, #tpu.memory_space<vmem>>, %arg3: memref<4x32x24xbf16, #tpu.memory_space<vmem>>, %arg4: memref<4x1x24xf32, #tpu.memory_space<vmem>>, %arg5: memref<1x4x8x8xbf16, #tpu.memory_space<vmem>>, %arg6: memref<1x4x8x8xbf16, #tpu.memory_space<vmem>>, %arg7: memref<1x4x8x8xbf16, #tpu.memory_space<vmem>>) attributes {dimension_semantics = [#tpu.dimension_semantics<parallel>, #tpu.dimension_semantics<parallel>], iteration_bounds = array<i64: 2, 1>, scalar_prefetch = 0 : i64, scratch_operands = 0 : i64, tpu.core_type = #tpu.core_type<tc>, window_params = [{transform_indices = @transform_0, window_bounds = array<i64: 1, 8, 32>}, {pipeline_mode = #tpu.pipeline_mode<synchronous>, transform_indices = @transform_1, window_bounds = array<i64: 4, 32, 24>}, {pipeline_mode = #tpu.pipeline_mode<synchronous>, transform_indices = @transform_2, window_bounds = array<i64: 4, 1, 24>}, {transform_indices = @transform_3, window_bounds = array<i64: 1, 4, 8, 8>}, {transform_indices = @transform_4, window_bounds = array<i64: 1, 4, 8, 8>}, {transform_indices = @transform_5, window_bounds = array<i64: 1, 4, 8, 8>}]} {
    %c0 = arith.constant 0 : index
    %c0_0 = arith.constant 0 : index
    %c0_1 = arith.constant 0 : index
    %0 = vector.load %arg2[%c0, %c0_0, %c0_1] : memref<1x8x32xf32, #tpu.memory_space<vmem>>, vector<1x8x32xf32>
    %1 = vector.shape_cast %0 : vector<1x8x32xf32> to vector<8x32xf32>
    %2 = arith.truncf %1 : vector<8x32xf32> to vector<8x32xbf16>
    %c0_2 = arith.constant 0 : index
    %c0_3 = arith.constant 0 : index
    %c0_4 = arith.constant 0 : index
    %3 = vector.load %arg3[%c0_2, %c0_3, %c0_4] : memref<4x32x24xbf16, #tpu.memory_space<vmem>>, vector<1x32x24xbf16>
    %4 = vector.shape_cast %3 : vector<1x32x24xbf16> to vector<32x24xbf16>
    %cst = arith.constant dense<0.000000e+00> : vector<8x24xf32>
    %5 = tpu.matmul %2, %4, %cst {dimension_numbers = #tpu.dot_dimension_numbers<[1], [0], [0], [1], [0, 0, 1, 1], [], []>} : vector<8x32xbf16>, vector<32x24xbf16>, vector<8x24xf32> -> vector<8x24xf32>
    %c0_5 = arith.constant 0 : index
    %c0_6 = arith.constant 0 : index
    %c0_7 = arith.constant 0 : index
    %6 = vector.load %arg4[%c0_5, %c0_6, %c0_7] : memref<4x1x24xf32, #tpu.memory_space<vmem>>, vector<1x1x24xf32>
    %7 = vector.shape_cast %6 : vector<1x1x24xf32> to vector<1x24xf32>
    %8 = vector.broadcast %7 : vector<1x24xf32> to vector<8x24xf32>
    %9 = arith.addf %5, %8 : vector<8x24xf32>
    %10 = vector.extract_strided_slice %9 {offsets = [0, 0], sizes = [8, 8], strides = [1, 1]} : vector<8x24xf32> to vector<8x8xf32>
    %11 = arith.truncf %10 : vector<8x8xf32> to vector<8x8xbf16>
    %c0_8 = arith.constant 0 : index
    %c0_9 = arith.constant 0 : index
    %c0_10 = arith.constant 0 : index
    %c0_11 = arith.constant 0 : index
    %12 = vector.load %arg5[%c0_8, %c0_9, %c0_10, %c0_11] : memref<1x4x8x8xbf16, #tpu.memory_space<vmem>>, vector<1x1x8x8xbf16>
    %13 = vector.shape_cast %12 : vector<1x1x8x8xbf16> to vector<8x8xbf16>
    %14 = vector.shape_cast %11 : vector<8x8xbf16> to vector<1x1x8x8xbf16>
    tpu.vector_store %arg5[%c0_8, %c0_9, %c0_10, %c0_11], %14 {strides = array<i32>} : memref<1x4x8x8xbf16, #tpu.memory_space<vmem>>, vector<1x1x8x8xbf16>,
    %15 = vector.extract_strided_slice %9 {offsets = [0, 8], sizes = [8, 8], strides = [1, 1]} : vector<8x24xf32> to vector<8x8xf32>
    %16 = arith.truncf %15 : vector<8x8xf32> to vector<8x8xbf16>
    %c0_12 = arith.constant 0 : index
    %c0_13 = arith.constant 0 : index
    %c0_14 = arith.constant 0 : index
    %c0_15 = arith.constant 0 : index
    %17 = vector.load %arg6[%c0_12, %c0_13, %c0_14, %c0_15] : memref<1x4x8x8xbf16, #tpu.memory_space<vmem>>, vector<1x1x8x8xbf16>
    %18 = vector.shape_cast %17 : vector<1x1x8x8xbf16> to vector<8x8xbf16>
    %19 = vector.shape_cast %16 : vector<8x8xbf16> to vector<1x1x8x8xbf16>
    tpu.vector_store %arg6[%c0_12, %c0_13, %c0_14, %c0_15], %19 {strides = array<i32>} : memref<1x4x8x8xbf16, #tpu.memory_space<vmem>>, vector<1x1x8x8xbf16>,
    %20 = vector.extract_strided_slice %9 {offsets = [0, 16], sizes = [8, 8], strides = [1, 1]} : vector<8x24xf32> to vector<8x8xf32>
    %21 = arith.truncf %20 : vector<8x8xf32> to vector<8x8xbf16>
    %c0_16 = arith.constant 0 : index
    %c0_17 = arith.constant 0 : index
    %c0_18 = arith.constant 0 : index
    %c0_19 = arith.constant 0 : index
    %22 = vector.load %arg7[%c0_16, %c0_17, %c0_18, %c0_19] : memref<1x4x8x8xbf16, #tpu.memory_space<vmem>>, vector<1x1x8x8xbf16>
    %23 = vector.shape_cast %22 : vector<1x1x8x8xbf16> to vector<8x8xbf16>
    %24 = vector.shape_cast %21 : vector<8x8xbf16> to vector<1x1x8x8xbf16>
    tpu.vector_store %arg7[%c0_16, %c0_17, %c0_18, %c0_19], %24 {strides = array<i32>} : memref<1x4x8x8xbf16, #tpu.memory_space<vmem>>, vector<1x1x8x8xbf16>,
    %c1 = arith.constant 1 : index
    %c0_20 = arith.constant 0 : index
    %c0_21 = arith.constant 0 : index
    %25 = vector.load %arg3[%c1, %c0_20, %c0_21] : memref<4x32x24xbf16, #tpu.memory_space<vmem>>, vector<1x32x24xbf16>
    %26 = vector.shape_cast %25 : vector<1x32x24xbf16> to vector<32x24xbf16>
    %cst_22 = arith.constant dense<0.000000e+00> : vector<8x24xf32>
    %27 = tpu.matmul %2, %26, %cst_22 {dimension_numbers = #tpu.dot_dimension_numbers<[1], [0], [0], [1], [0, 0, 1, 1], [], []>} : vector<8x32xbf16>, vector<32x24xbf16>, vector<8x24xf32> -> vector<8x24xf32>
    %c1_23 = arith.constant 1 : index
    %c0_24 = arith.constant 0 : index
    %c0_25 = arith.constant 0 : index
    %28 = vector.load %arg4[%c1_23, %c0_24, %c0_25] : memref<4x1x24xf32, #tpu.memory_space<vmem>>, vector<1x1x24xf32>
    %29 = vector.shape_cast %28 : vector<1x1x24xf32> to vector<1x24xf32>
    %30 = vector.broadcast %29 : vector<1x24xf32> to vector<8x24xf32>
    %31 = arith.addf %27, %30 : vector<8x24xf32>
    %32 = vector.extract_strided_slice %31 {offsets = [0, 0], sizes = [8, 8], strides = [1, 1]} : vector<8x24xf32> to vector<8x8xf32>
    %33 = arith.truncf %32 : vector<8x8xf32> to vector<8x8xbf16>
    %c0_26 = arith.constant 0 : index
    %c1_27 = arith.constant 1 : index
    %c0_28 = arith.constant 0 : index
    %c0_29 = arith.constant 0 : index
    %34 = vector.load %arg5[%c0_26, %c1_27, %c0_28, %c0_29] : memref<1x4x8x8xbf16, #tpu.memory_space<vmem>>, vector<1x1x8x8xbf16>
    %35 = vector.shape_cast %34 : vector<1x1x8x8xbf16> to vector<8x8xbf16>
    %36 = vector.shape_cast %33 : vector<8x8xbf16> to vector<1x1x8x8xbf16>
    tpu.vector_store %arg5[%c0_26, %c1_27, %c0_28, %c0_29], %36 {strides = array<i32>} : memref<1x4x8x8xbf16, #tpu.memory_space<vmem>>, vector<1x1x8x8xbf16>,
    %37 = vector.extract_strided_slice %31 {offsets = [0, 8], sizes = [8, 8], strides = [1, 1]} : vector<8x24xf32> to vector<8x8xf32>
    %38 = arith.truncf %37 : vector<8x8xf32> to vector<8x8xbf16>
    %c0_30 = arith.constant 0 : index
    %c1_31 = arith.constant 1 : index
    %c0_32 = arith.constant 0 : index
    %c0_33 = arith.constant 0 : index
    %39 = vector.load %arg6[%c0_30, %c1_31, %c0_32, %c0_33] : memref<1x4x8x8xbf16, #tpu.memory_space<vmem>>, vector<1x1x8x8xbf16>
    %40 = vector.shape_cast %39 : vector<1x1x8x8xbf16> to vector<8x8xbf16>
    %41 = vector.shape_cast %38 : vector<8x8xbf16> to vector<1x1x8x8xbf16>
    tpu.vector_store %arg6[%c0_30, %c1_31, %c0_32, %c0_33], %41 {strides = array<i32>} : memref<1x4x8x8xbf16, #tpu.memory_space<vmem>>, vector<1x1x8x8xbf16>,
    %42 = vector.extract_strided_slice %31 {offsets = [0, 16], sizes = [8, 8], strides = [1, 1]} : vector<8x24xf32> to vector<8x8xf32>
    %43 = arith.truncf %42 : vector<8x8xf32> to vector<8x8xbf16>
    %c0_34 = arith.constant 0 : index
    %c1_35 = arith.constant 1 : index
    %c0_36 = arith.constant 0 : index
    %c0_37 = arith.constant 0 : index
    %44 = vector.load %arg7[%c0_34, %c1_35, %c0_36, %c0_37] : memref<1x4x8x8xbf16, #tpu.memory_space<vmem>>, vector<1x1x8x8xbf16>
    %45 = vector.shape_cast %44 : vector<1x1x8x8xbf16> to vector<8x8xbf16>
    %46 = vector.shape_cast %43 : vector<8x8xbf16> to vector<1x1x8x8xbf16>
    tpu.vector_store %arg7[%c0_34, %c1_35, %c0_36, %c0_37], %46 {strides = array<i32>} : memref<1x4x8x8xbf16, #tpu.memory_space<vmem>>, vector<1x1x8x8xbf16>,
    %c2 = arith.constant 2 : index
    %c0_38 = arith.constant 0 : index
    %c0_39 = arith.constant 0 : index
    %47 = vector.load %arg3[%c2, %c0_38, %c0_39] : memref<4x32x24xbf16, #tpu.memory_space<vmem>>, vector<1x32x24xbf16>
    %48 = vector.shape_cast %47 : vector<1x32x24xbf16> to vector<32x24xbf16>
    %cst_40 = arith.constant dense<0.000000e+00> : vector<8x24xf32>
    %49 = tpu.matmul %2, %48, %cst_40 {dimension_numbers = #tpu.dot_dimension_numbers<[1], [0], [0], [1], [0, 0, 1, 1], [], []>} : vector<8x32xbf16>, vector<32x24xbf16>, vector<8x24xf32> -> vector<8x24xf32>
    %c2_41 = arith.constant 2 : index
    %c0_42 = arith.constant 0 : index
    %c0_43 = arith.constant 0 : index
    %50 = vector.load %arg4[%c2_41, %c0_42, %c0_43] : memref<4x1x24xf32, #tpu.memory_space<vmem>>, vector<1x1x24xf32>
    %51 = vector.shape_cast %50 : vector<1x1x24xf32> to vector<1x24xf32>
    %52 = vector.broadcast %51 : vector<1x24xf32> to vector<8x24xf32>
    %53 = arith.addf %49, %52 : vector<8x24xf32>
    %54 = vector.extract_strided_slice %53 {offsets = [0, 0], sizes = [8, 8], strides = [1, 1]} : vector<8x24xf32> to vector<8x8xf32>
    %55 = arith.truncf %54 : vector<8x8xf32> to vector<8x8xbf16>
    %c0_44 = arith.constant 0 : index
    %c2_45 = arith.constant 2 : index
    %c0_46 = arith.constant 0 : index
    %c0_47 = arith.constant 0 : index
    %56 = vector.load %arg5[%c0_44, %c2_45, %c0_46, %c0_47] : memref<1x4x8x8xbf16, #tpu.memory_space<vmem>>, vector<1x1x8x8xbf16>
    %57 = vector.shape_cast %56 : vector<1x1x8x8xbf16> to vector<8x8xbf16>
    %58 = vector.shape_cast %55 : vector<8x8xbf16> to vector<1x1x8x8xbf16>
    tpu.vector_store %arg5[%c0_44, %c2_45, %c0_46, %c0_47], %58 {strides = array<i32>} : memref<1x4x8x8xbf16, #tpu.memory_space<vmem>>, vector<1x1x8x8xbf16>,
    %59 = vector.extract_strided_slice %53 {offsets = [0, 8], sizes = [8, 8], strides = [1, 1]} : vector<8x24xf32> to vector<8x8xf32>
    %60 = arith.truncf %59 : vector<8x8xf32> to vector<8x8xbf16>
    %c0_48 = arith.constant 0 : index
    %c2_49 = arith.constant 2 : index
    %c0_50 = arith.constant 0 : index
    %c0_51 = arith.constant 0 : index
    %61 = vector.load %arg6[%c0_48, %c2_49, %c0_50, %c0_51] : memref<1x4x8x8xbf16, #tpu.memory_space<vmem>>, vector<1x1x8x8xbf16>
    %62 = vector.shape_cast %61 : vector<1x1x8x8xbf16> to vector<8x8xbf16>
    %63 = vector.shape_cast %60 : vector<8x8xbf16> to vector<1x1x8x8xbf16>
    tpu.vector_store %arg6[%c0_48, %c2_49, %c0_50, %c0_51], %63 {strides = array<i32>} : memref<1x4x8x8xbf16, #tpu.memory_space<vmem>>, vector<1x1x8x8xbf16>,
    %64 = vector.extract_strided_slice %53 {offsets = [0, 16], sizes = [8, 8], strides = [1, 1]} : vector<8x24xf32> to vector<8x8xf32>
    %65 = arith.truncf %64 : vector<8x8xf32> to vector<8x8xbf16>
    %c0_52 = arith.constant 0 : index
    %c2_53 = arith.constant 2 : index
    %c0_54 = arith.constant 0 : index
    %c0_55 = arith.constant 0 : index
    %66 = vector.load %arg7[%c0_52, %c2_53, %c0_54, %c0_55] : memref<1x4x8x8xbf16, #tpu.memory_space<vmem>>, vector<1x1x8x8xbf16>
    %67 = vector.shape_cast %66 : vector<1x1x8x8xbf16> to vector<8x8xbf16>
    %68 = vector.shape_cast %65 : vector<8x8xbf16> to vector<1x1x8x8xbf16>
    tpu.vector_store %arg7[%c0_52, %c2_53, %c0_54, %c0_55], %68 {strides = array<i32>} : memref<1x4x8x8xbf16, #tpu.memory_space<vmem>>, vector<1x1x8x8xbf16>,
    %c3 = arith.constant 3 : index
    %c0_56 = arith.constant 0 : index
    %c0_57 = arith.constant 0 : index
    %69 = vector.load %arg3[%c3, %c0_56, %c0_57] : memref<4x32x24xbf16, #tpu.memory_space<vmem>>, vector<1x32x24xbf16>
    %70 = vector.shape_cast %69 : vector<1x32x24xbf16> to vector<32x24xbf16>
    %cst_58 = arith.constant dense<0.000000e+00> : vector<8x24xf32>
    %71 = tpu.matmul %2, %70, %cst_58 {dimension_numbers = #tpu.dot_dimension_numbers<[1], [0], [0], [1], [0, 0, 1, 1], [], []>} : vector<8x32xbf16>, vector<32x24xbf16>, vector<8x24xf32> -> vector<8x24xf32>
    %c3_59 = arith.constant 3 : index
    %c0_60 = arith.constant 0 : index
    %c0_61 = arith.constant 0 : index
    %72 = vector.load %arg4[%c3_59, %c0_60, %c0_61] : memref<4x1x24xf32, #tpu.memory_space<vmem>>, vector<1x1x24xf32>
    %73 = vector.shape_cast %72 : vector<1x1x24xf32> to vector<1x24xf32>
    %74 = vector.broadcast %73 : vector<1x24xf32> to vector<8x24xf32>
    %75 = arith.addf %71, %74 : vector<8x24xf32>
    %76 = vector.extract_strided_slice %75 {offsets = [0, 0], sizes = [8, 8], strides = [1, 1]} : vector<8x24xf32> to vector<8x8xf32>
    %77 = arith.truncf %76 : vector<8x8xf32> to vector<8x8xbf16>
    %c0_62 = arith.constant 0 : index
    %c3_63 = arith.constant 3 : index
    %c0_64 = arith.constant 0 : index
    %c0_65 = arith.constant 0 : index
    %78 = vector.load %arg5[%c0_62, %c3_63, %c0_64, %c0_65] : memref<1x4x8x8xbf16, #tpu.memory_space<vmem>>, vector<1x1x8x8xbf16>
    %79 = vector.shape_cast %78 : vector<1x1x8x8xbf16> to vector<8x8xbf16>
    %80 = vector.shape_cast %77 : vector<8x8xbf16> to vector<1x1x8x8xbf16>
    tpu.vector_store %arg5[%c0_62, %c3_63, %c0_64, %c0_65], %80 {strides = array<i32>} : memref<1x4x8x8xbf16, #tpu.memory_space<vmem>>, vector<1x1x8x8xbf16>,
    %81 = vector.extract_strided_slice %75 {offsets = [0, 8], sizes = [8, 8], strides = [1, 1]} : vector<8x24xf32> to vector<8x8xf32>
    %82 = arith.truncf %81 : vector<8x8xf32> to vector<8x8xbf16>
    %c0_66 = arith.constant 0 : index
    %c3_67 = arith.constant 3 : index
    %c0_68 = arith.constant 0 : index
    %c0_69 = arith.constant 0 : index
    %83 = vector.load %arg6[%c0_66, %c3_67, %c0_68, %c0_69] : memref<1x4x8x8xbf16, #tpu.memory_space<vmem>>, vector<1x1x8x8xbf16>
    %84 = vector.shape_cast %83 : vector<1x1x8x8xbf16> to vector<8x8xbf16>
    %85 = vector.shape_cast %82 : vector<8x8xbf16> to vector<1x1x8x8xbf16>
    tpu.vector_store %arg6[%c0_66, %c3_67, %c0_68, %c0_69], %85 {strides = array<i32>} : memref<1x4x8x8xbf16, #tpu.memory_space<vmem>>, vector<1x1x8x8xbf16>,
    %86 = vector.extract_strided_slice %75 {offsets = [0, 16], sizes = [8, 8], strides = [1, 1]} : vector<8x24xf32> to vector<8x8xf32>
    %87 = arith.truncf %86 : vector<8x8xf32> to vector<8x8xbf16>
    %c0_70 = arith.constant 0 : index
    %c3_71 = arith.constant 3 : index
    %c0_72 = arith.constant 0 : index
    %c0_73 = arith.constant 0 : index
    %88 = vector.load %arg7[%c0_70, %c3_71, %c0_72, %c0_73] : memref<1x4x8x8xbf16, #tpu.memory_space<vmem>>, vector<1x1x8x8xbf16>
    %89 = vector.shape_cast %88 : vector<1x1x8x8xbf16> to vector<8x8xbf16>
    %90 = vector.shape_cast %87 : vector<8x8xbf16> to vector<1x1x8x8xbf16>
    tpu.vector_store %arg7[%c0_70, %c3_71, %c0_72, %c0_73], %90 {strides = array<i32>} : memref<1x4x8x8xbf16, #tpu.memory_space<vmem>>, vector<1x1x8x8xbf16>,
    return
  }
  func.func @transform_0(%arg0: i32, %arg1: i32) -> (i32, i32, i32) {
    %c0_i32 = arith.constant 0 : i32
    %c0_i32_0 = arith.constant 0 : i32
    return %arg0, %arg1, %c0_i32 : i32, i32, i32
  }
  func.func @transform_1(%arg0: i32, %arg1: i32) -> (i32, i32, i32) {
    %c0_i32 = arith.constant 0 : i32
    %c0_i32_0 = arith.constant 0 : i32
    %c0_i32_1 = arith.constant 0 : i32
    %c0_i32_2 = arith.constant 0 : i32
    return %c0_i32, %c0_i32_0, %c0_i32_1 : i32, i32, i32
  }
  func.func @transform_2(%arg0: i32, %arg1: i32) -> (i32, i32, i32) {
    %c0_i32 = arith.constant 0 : i32
    %c0_i32_0 = arith.constant 0 : i32
    %c0_i32_1 = arith.constant 0 : i32
    %c0_i32_2 = arith.constant 0 : i32
    return %c0_i32, %c0_i32_0, %c0_i32_1 : i32, i32, i32
  }
  func.func @transform_3(%arg0: i32, %arg1: i32) -> (i32, i32, i32, i32) {
    %c0_i32 = arith.constant 0 : i32
    %c0_i32_0 = arith.constant 0 : i32
    %c0_i32_1 = arith.constant 0 : i32
    return %arg0, %c0_i32, %arg1, %c0_i32_0 : i32, i32, i32, i32
  }
  func.func @transform_4(%arg0: i32, %arg1: i32) -> (i32, i32, i32, i32) {
    %c0_i32 = arith.constant 0 : i32
    %c0_i32_0 = arith.constant 0 : i32
    %c0_i32_1 = arith.constant 0 : i32
    return %arg0, %c0_i32, %arg1, %c0_i32_0 : i32, i32, i32, i32
  }
  func.func @transform_5(%arg0: i32, %arg1: i32) -> (i32, i32, i32, i32) {
    %c0_i32 = arith.constant 0 : i32
    %c0_i32_0 = arith.constant 0 : i32
    %c0_i32_1 = arith.constant 0 : i32
    return %arg0, %c0_i32, %arg1, %c0_i32_0 : i32, i32, i32, i32
  }
}

</mosaic_0001>

<bundles_post_ra>
// kernel: tpu_custom_call.1
= control target key start
LH: loop header
LB: loop body
LE: loop exit
PB: predicated region body
PF: predicated region fallthrough
CT: control target
= control target key end

     0   :  { %11 = vsyncpa [#allocation3], 0  ;;  %s1439_s0 = inlined_call_operand.vmem [shape: f32[2,8,32], index: 0, kind: input, shape index: {}]   ;;  %s1440_s1 = inlined_call_operand.vmem [shape: bf16[4,32,24], index: 1, kind: input, shape index: {}]   ;;  %s1441_s2 = inlined_call_operand.vmem [shape: f32[4,1,24], index: 2, kind: input, shape index: {}]   ;;  %s1442_s3 = inlined_call_operand.hbm [shape: bf16[2,4,8,8], index: 3, kind: output, shape index: {0}]   ;;  %s1443_s4 = inlined_call_operand.hbm [shape: bf16[2,4,8,8], index: 4, kind: output, shape index: {1}]   ;;  %s1444_s5 = inlined_call_operand.hbm [shape: bf16[2,4,8,8], index: 5, kind: output, shape index: {2}]  }
   0x1   :  { %13 = vsyncpa [#allocation3 + $0x1], 0 }
   0x2   :  { %14 = vsyncpa [#allocation5], 0 }
   0x3   :  { %16 = vsyncpa [#allocation5 + $0x1], 0  ;;  %s1160_s18 = smov 0   ;;  %s1162_s19 = smov 0  }
   0x4   :  { %s1164_s20 = smov 0   ;;  %s1166_s21 = smov 0  }
   0x5   :  { %s1168_s22 = smov 0   ;;  %s1170_s23 = smov 0  }
   0x6 LB: > { %s1446_s24 = sadd.s32 4294967295, %s1119_s23   ;;  %s1445_s25 = sadd.s32 4294967294, %s1119_s23   ;;  %s1119_s23 = sphi %s1170_s23, %s22_s23   ;;  %s1115_s22 = sphi %s1168_s22, %s1458_s22   ;;  %s1111_s21 = sphi %s1166_s21, %s1457_s21   ;;  %s1107_s20 = sphi %s1164_s20, %s1456_s20   ;;  %s1103_s19 = sphi %s1162_s19, %s1455_s19   ;;  %s1099_s18 = sphi %s1160_s18, %s1454_s18  }
   0x7   : > { %s34_s26 = sadd.s32 1, %s1115_s22  ;;  %s113_s27 = sadd.s32 1, %s1107_s20 }
   0x8   : > { %p36_p0 = scmp.ge.s32.totalorder %s34_s26, 2  ;;  %p123_p1 = scmp.ne.s32.totalorder %s1107_s20, %s1103_s19 }
   0x9   : > { %p124_p2 = scmp.eq.s32.totalorder %s1446_s24, 1  ;;  %p129_p3 = scmp.ne.s32.totalorder %s1103_s19, %s1099_s18 }
   0xa   : > { %s1460_s26 = smov (%p36_p0, %s34_s26), 0  ;;  %p130_p5 = scmp.eq.s32.totalorder %s1445_s25, 1 }
   0xb   : > { %p1202_p4 = por %p124_p2, %p123_p1  ;;  %s108_s29 = ssub.s32 %s1115_s22, %s1460_s26 }
   0xc   : > { %p797_p6 = scmp.ge.s32.totalorder %s1119_s23, 1  ;;  %p111_p7 = scmp.eq.s32.totalorder %s108_s29, 0 }
   0xd   : > { %p1211_p8 = por %p130_p5, %p129_p3  ;;  %p220_p9 = scmp.lt.s32.totalorder %s1119_s23, 3 }
   0xe   : > { %s1217_s6 = scalar_select %p111_p7, %s1107_s20, %s113_s27  }
   0xf   : > { %p221_p10 = pnand %p797_p6, %p220_p9 }
  0x10   : > { %p260_p11 = scmp.lt.s32.totalorder (!%p221_p10), %s1111_s21, 1  ;;  %s1123_s9 = smov (!%p221_p10), 120  }
  0x11   : > { %224 = sbr.rel (%p221_p10) target bundleno = 402 (0x192), region = 32  ;;  %s1124_s10 = smov (!%p221_p10), 112  }
  0x12   : > { %s1279_s27 = sshll.u32 (!%p221_p10), %s1111_s21, 8  ;;  %s1125_s13 = smov (!%p221_p10), [#allocation2]  }
  0x13   : > { %s991_s14 = sshll.u32 (!%p221_p10), %s1125_s13, 4  ;;  %s992_s14 = int_to_ptr.vmem [resolvable:$false] %s991_s14 }
  0x16   : > { %v979_v0 = vld [vmem:[%s1440_s1 + $0x8] sm:$0xff]   ;;  %v1121_v1 = vmov 0.0   ;;  %v980_v2 = vld [vmem:[%s1440_s1 + $0x18] sm:$0xff]   ;;  %v981_v3 = vld [vmem:[%s1440_s1] sm:$0xff]   ;;  %vm1122_vm0 = vmmov 0   ;;  %s261_s15 = scalar_select %p260_p11, %s1111_s21, 1 }
  0x17   : > { %876 = vmatprep.subr.bf16.mxu0 %v1121_v1  ;;  %884 = vmatprep.subr.bf16.mxu1 %v1121_v1  ;;  %v982_v4 = vld [vmem:[%s1440_s1 + $0x10] sm:$0xff]   ;;  %vm293_vm1 = vcmask 261120   ;;  %v983_v6 = vld [vmem:[%s1440_s1 + $0x28] sm:$0xff]   ;;  %v984_v7 = vld [vmem:[%s1440_s1 + $0x38] sm:$0xff]   ;;  %vm338_vm2 = vcmask 60416   ;;  %s1288_s21 = scalar_lea.hbm %s1442_s3, %s1279_s27 }
  0x18   : > { %877 = vmatpush3.bf16.msra.mxu0 %v979_v0  ;;  %880 = vmatprep.mubr.msk.bf16.mxu0 %vm1122_vm0, %v1121_v1  ;;  %s801_s16 = sshll.u32 %s261_s15, 3  ;;  %v985_v9 = vld [vmem:[%s1440_s1 + $0x20] sm:$0xff]   ;;  %v986_v10 = vld [vmem:[%s1440_s1 + $0x30] sm:$0xff]   ;;  %s243_s15 = sand.u32 1, %s1103_s19  }
  0x19   : > { %885 = vmatpush3.bf16.msra.mxu1 %v980_v2  ;;  %878 = vmatprep.subr.bf16.mxu0 %v1121_v1  ;;  %s266_s29 = scalar_lea.vmem %s1439_s0, %s801_s16  ;;  %s1259_s16 = sshll.u32 %s243_s15, 4  ;;  %v802_v11 = vld [vmem:[%s1441_s2] ss:$0 sm:$0xff]  ;;  %v812_v12 = vld [vmem:[%s1441_s2 + $0x1] ss:$0 sm:$0xff] }
  0x1a   : > { %886 = vmatprep.subr.bf16.mxu1 %v1121_v1  ;;  %888 = vmatprep.mubr.msk.bf16.mxu1 %vm1122_vm0, %v1121_v1  ;;  %v268_v5 = vld [vmem:[%s266_s29] sm:$0xff]  ;;  %s245_s8 = scalar_lea.vmem [#allocation2], %s1259_s16  ;;  %s1296_s11 = scalar_lea.sflag [#allocation3], %s243_s15 }
  0x1b   : > { %v269_v8 = vpack.c.bf16 %v268_v5, %v268_v5  ;;  %v825_v25 = vld [vmem:[%s1441_s2 + $0x2] ss:$0 sm:$0xff]  ;;  %v838_v26 = vld [vmem:[%s1441_s2 + $0x3] ss:$0 sm:$0xff]  ;;  %s619_s17 = sshll.u32 %s245_s8, 4  ;;  %s993_s29 = scalar_lea.vmem %s992_s14, 512  ;;  %s1282_s17 = int_to_ptr.vmem [resolvable:$true] %s619_s17 }
  0x1c   : > { %879 = vmatpush3.bf16.msra.mxu0 %v981_v3  ;;  %s987_s12 = scalar_lea.vmem %s1282_s17, 256  ;;  %p994_p1 = scmp.lt.s32.totalorder %s1282_s17, %s992_s14 }
  0x1d   : > { %887 = vmatpush3.bf16.msra.mxu1 %v982_v4  ;;  %892 = vmatprep.subr.bf16.mxu0 %v1121_v1  ;;  %p988_p12 = scmp.ne.s32.totalorder %s1282_s17, %s987_s12  ;;  %p995_p2 = scmp.lt.s32.totalorder %s993_s29, %s987_s12 }
  0x1e   : > { %900 = vmatprep.subr.bf16.mxu1 %v1121_v1 }
  0x1f   : > { %881 = vmatmul.mubr.msk.bf16.vlgmr.msra.gmra.mxu0 %vm293_vm1, %v269_v8  ;;  %p989_p13 = pnand %p988_p12, %p1202_p4  ;;  %p996_p3 = por %p995_p2, %p994_p1 }
  0x20   : > { %889 = vmatmul.mubr.msk.bf16.vlgmr.msra.gmra.mxu1 %vm293_vm1, %v269_v8  ;;  %893 = vmatpush3.bf16.msra.mxu0 %v983_v6 }
  0x21   : > { %901 = vmatpush3.bf16.msra.mxu1 %v984_v7  ;;  %894 = vmatprep.subr.bf16.mxu0 %v1121_v1  ;;  %p990_p0 = pneg %p989_p13 }
  0x22   : > { %902 = vmatprep.subr.bf16.mxu1 %v1121_v1  ;;  %896 = vmatprep.mubr.msk.bf16.mxu0 %vm1122_vm0, %v1121_v1 }
  0x23   : > { %904 = vmatprep.mubr.msk.bf16.mxu1 %vm1122_vm0, %v1121_v1  ;;  %p997_p5 = pnand %p996_p3, %p990_p0 }
  0x24   : > { %895 = vmatpush3.bf16.msra.mxu0 %v985_v9 }
  0x25   : > { %903 = vmatpush3.bf16.msra.mxu1 %v986_v10 }
  0x27   : > { %897 = vmatmul.mubr.msk.bf16.vlgmr.msra.gmra.mxu0 %vm293_vm1, %v269_v8 }
  0x28   : > { %905 = vmatmul.mubr.msk.bf16.vlgmr.msra.gmra.mxu1 %vm293_vm1, %v269_v8 }
  0xdf   : > { %v331_v13 = vpop.f32.mrf.mxu0 }
  0xe0   : > { %v410_v14 = vpop.f32.mrf.mxu1  ;;  %v332_v15 = vadd.f32 %v802_v11, %v331_v13 }
  0xe1   : > { %v411_v16 = vadd.f32 %v812_v12, %v410_v14  ;;  %v882_v17 = vpop.f32.mrf.mxu0 }
  0xe2   : > { %v890_v18 = vpop.f32.mrf.mxu1  ;;  %v337_v19 = vpack.c.bf16 %v332_v15, %v332_v15 }
  0xe3   : > { %v416_v20 = vpack.c.bf16 %v411_v16, %v411_v16  ;;  %v334_v21 = vpop.f32.mrf.mxu0 }
  0xe4   : > { %v413_v22 = vpop.f32.mrf.mxu1  ;;  %339 = vst.msk [vmem:[%s245_s8] sm:$0xf] %vm338_vm2, %v337_v19  ;;  %343 = vrot.lane.b32.xlu0 %v337_v19, %s1123_s9 }
  0xe5   : > { %816 = vst.msk [vmem:[%s245_s8 + $0x4] sm:$0xf] %vm338_vm2, %v416_v20  ;;  %427 = vrot.lane.b32.xlu1 %v416_v20, %s1124_s10  ;;  %v883_v23 = vpop.f32.mrf.mxu0 }
  0xe6   : > { %v891_v24 = vpop.f32.mrf.mxu1 }
  0xe7   : > { %v491_v27 = vpop.f32.mrf.mxu0 }
  0xe8   : > { %v572_v28 = vpop.f32.mrf.mxu1  ;;  %v492_v29 = vadd.f32 %v825_v25, %v491_v27  ;;  %422 = vrot.lane.b32.xlu0 %v416_v20, %s1123_s9 }
  0xe9   : > { %v573_v30 = vadd.f32 %v838_v26, %v572_v28  ;;  %v898_v31 = vpop.f32.mrf.mxu0 }
  0xea   : > { %v906_v32 = vpop.f32.mrf.mxu1  ;;  %v497_v33 = vpack.c.bf16 %v492_v29, %v492_v29 }
  0xeb   : > { %v578_v34 = vpack.c.bf16 %v573_v30, %v573_v30  ;;  %v494_v35 = vpop.f32.mrf.mxu0 }
  0xec   : > { %v575_v36 = vpop.f32.mrf.mxu1  ;;  %829 = vst.msk [vmem:[%s245_s8 + $0x8] sm:$0xf] %vm338_vm2, %v497_v33  ;;  %347 = vrot.lane.b32.xlu0 %v337_v19, %s1124_s10  ;;  %503 = vrot.lane.b32.xlu1 %v497_v33, %s1123_s9 }
  0xed   : > { %842 = vst.msk [vmem:[%s245_s8 + $0xc] sm:$0xf] %vm338_vm2, %v578_v34  ;;  %v899_v37 = vpop.f32.mrf.mxu0 }
  0xee   : > { %v907_v38 = vpop.f32.mrf.mxu1 }
  0xef   : > { %1000 = shalt.err (!%p997_p5)
}
  0xf0   : > { %s1001_s15 = scalar_lea.hbm %s1288_s21, 256  ;;  %s1005_s13 = scalar_lea.hbm %s1442_s3, 512 }
  0xf1   : > { %p1002_p6 = scmp.ne.s32.totalorder %s1288_s21, %s1001_s15  ;;  %p1006_p10 = scmp.lt.s32.totalorder %s1288_s21, %s1442_s3 }
  0xf2   : > { %p1007_p11 = scmp.lt.s32.totalorder %s1005_s13, %s1001_s15 }
  0xf3   : > { %p1003_p7 = pnand %p1002_p6, %p1202_p4 }
  0xf4   : > { %p1008_p12 = por %p1007_p11, %p1006_p10 }
  0xf5   : > { %p1004_p9 = pneg %p1003_p7 }
  0xf7   : > { %p1009_p13 = pnand %p1008_p12, %p1004_p9 }
  0xf9   : > { %1012 = shalt.err (!%p1009_p13)
}
  0xfa   : > { %s1126_s12 = smov 64   ;;  %s1127_s14 = smov 4   ;;  %508 = vrot.lane.b32.xlu0 %v497_v33, %s1124_s10  ;;  %584 = vrot.lane.b32.xlu1 %v578_v34, %s1123_s9 }
  0xfb   : > { %908 = dma.vmem_to_hbm [thread:$0]  (%p1202_p4), %s1282_s17, 256, %s1288_s21, %s1296_s11, %s1126_s12, %s1126_s12, %s1127_s14  }
  0xfc   : > { %s252_s24 = scalar_lea.vmem [#allocation4], %s1259_s16  ;;  %s1328_s25 = scalar_lea.vmem [#allocation6], %s1259_s16 }
  0xfd   : > { %s636_s9 = sshll.u32 %s252_s24, 4  ;;  %s1346_s11 = scalar_lea.hbm %s1443_s4, %s1279_s27  ;;  %s1340_s9 = int_to_ptr.vmem [resolvable:$true] %s636_s9 }
  0xfe   : > { %589 = vrot.lane.b32.xlu1 %v578_v34, %s1124_s10  ;;  %s1449_s10 = sadd.s32 4294967295, %s1119_s23   ;;  %s1013_s8 = scalar_lea.vmem %s1340_s9, 256 }
  0xff   : > { %s1335_s17 = sand.u32 1, %s1449_s10   ;;  %p1014_p0 = scmp.ne.s32.totalorder %s1340_s9, %s1013_s8 }
 0x100   : > { %s1128_s7 = smov [#allocation4]  }
 0x101   : > { %p1015_p1 = pnand %p1014_p0, %p1202_p4  ;;  %s1017_s13 = sshll.u32 %s1128_s7, 4  ;;  %s1018_s13 = int_to_ptr.vmem [resolvable:$false] %s1017_s13 }
 0x102   : > { %s1019_s10 = scalar_lea.vmem %s1018_s13, 512  ;;  %p1020_p3 = scmp.lt.s32.totalorder %s1340_s9, %s1018_s13 }
 0x103   : > { %p1016_p2 = pneg %p1015_p1  ;;  %p1021_p5 = scmp.lt.s32.totalorder %s1019_s10, %s1013_s8 }
 0x105   : > { %p1022_p6 = por %p1021_p5, %p1020_p3 }
 0x107   : > { %p1023_p7 = pnand %p1022_p6, %p1016_p2 }
 0x156   : > { %v344_v39 = vpop.permute.xlu0 %343 }
 0x157   : > { %v428_v40 = vpop.permute.xlu1 %427  ;;  %346 = vst.msk [vmem:[%s252_s24] sm:$0xf] %vm338_vm2, %v344_v39 }
 0x158   : > { %819 = vst.msk [vmem:[%s1328_s25 + $0x4] sm:$0xf] %vm338_vm2, %v428_v40 }
 0x15a   : > { %v423_v41 = vpop.permute.xlu0 %422 }
 0x15b   : > { %818 = vst.msk [vmem:[%s252_s24 + $0x4] sm:$0xf] %vm338_vm2, %v423_v41 }
 0x15e   : > { %v348_v42 = vpop.permute.xlu0 %347  ;;  %v504_v43 = vpop.permute.xlu1 %503 }
 0x15f   : > { %350 = vst.msk [vmem:[%s1328_s25] sm:$0xf] %vm338_vm2, %v348_v42  ;;  %831 = vst.msk [vmem:[%s252_s24 + $0x8] sm:$0xf] %vm338_vm2, %v504_v43 }
 0x16c   : > { %v509_v44 = vpop.permute.xlu0 %508  ;;  %v585_v45 = vpop.permute.xlu1 %584 }
 0x16d   : > { %832 = vst.msk [vmem:[%s1328_s25 + $0x8] sm:$0xf] %vm338_vm2, %v509_v44  ;;  %844 = vst.msk [vmem:[%s252_s24 + $0xc] sm:$0xf] %vm338_vm2, %v585_v45 }
 0x16e   : > { %1026 = shalt.err (!%p1023_p7)
}
 0x16f   : > { %s1027_s24 = scalar_lea.hbm %s1346_s11, 256  ;;  %s1031_s7 = scalar_lea.hbm %s1443_s4, 512 }
 0x170   : > { %p1028_p9 = scmp.ne.s32.totalorder %s1346_s11, %s1027_s24  ;;  %p1032_p12 = scmp.lt.s32.totalorder %s1346_s11, %s1443_s4 }
 0x171   : > { %p1033_p13 = scmp.lt.s32.totalorder %s1031_s7, %s1027_s24 }
 0x172   : > { %p1029_p10 = pnand %p1028_p9, %p1202_p4 }
 0x173   : > { %p1034_p0 = por %p1033_p13, %p1032_p12 }
 0x174   : > { %p1030_p11 = pneg %p1029_p10 }
 0x176   : > { %p1035_p1 = pnand %p1034_p0, %p1030_p11 }
 0x178   : > { %1038 = shalt.err (!%p1035_p1)
}
 0x179   : > { %s1450_s8 = scalar_lea.sflag [#allocation5], %s1335_s17  ;;  %s1451_s29 = sshll.u32 %s1328_s25, 4  ;;  %v590_v46 = vpop.permute.xlu1 %589  ;;  %s1380_s29 = int_to_ptr.vmem [resolvable:$true] %s1451_s29 }
 0x17a   : > { %909 = dma.vmem_to_hbm [thread:$0]  (%p1202_p4), %s1340_s9, 256, %s1346_s11, %s1450_s8, %s1126_s12, %s1126_s12, %s1127_s14  }
 0x17b   : > { %s1386_s10 = scalar_lea.hbm %s1444_s5, %s1279_s27  ;;  %845 = vst.msk [vmem:[%s1328_s25 + $0xc] sm:$0xf] %vm338_vm2, %v590_v46  ;;  %s1039_s24 = scalar_lea.vmem %s1380_s29, 256 }
 0x17c   : > { %p1040_p2 = scmp.ne.s32.totalorder %s1380_s29, %s1039_s24  ;;  %s1129_s9 = smov [#allocation6]  }
 0x17d   : > { %s1043_s11 = sshll.u32 %s1129_s9, 4  ;;  %s1044_s11 = int_to_ptr.vmem [resolvable:$false] %s1043_s11 }
 0x17e   : > { %p1041_p3 = pnand %p1040_p2, %p1202_p4  ;;  %s1045_s16 = scalar_lea.vmem %s1044_s11, 512 }
 0x17f   : > { %p1046_p6 = scmp.lt.s32.totalorder %s1380_s29, %s1044_s11  ;;  %p1047_p7 = scmp.lt.s32.totalorder %s1045_s16, %s1039_s24 }
 0x180   : > { %p1042_p5 = pneg %p1041_p3 }
 0x181   : > { %p1048_p9 = por %p1047_p7, %p1046_p6 }
 0x183   : > { %p1049_p10 = pnand %p1048_p9, %p1042_p5 }
 0x185   : > { %1052 = shalt.err (!%p1049_p10)
}
 0x186   : > { %s1053_s27 = scalar_lea.hbm %s1386_s10, 256  ;;  %s1057_s7 = scalar_lea.hbm %s1444_s5, 512 }
 0x187   : > { %p1054_p11 = scmp.ne.s32.totalorder %s1386_s10, %s1053_s27  ;;  %p1058_p0 = scmp.lt.s32.totalorder %s1386_s10, %s1444_s5 }
 0x188   : > { %p1059_p1 = scmp.lt.s32.totalorder %s1057_s7, %s1053_s27 }
 0x189   : > { %p1055_p12 = pnand %p1054_p11, %p1202_p4 }
 0x18a   : > { %p1060_p2 = por %p1059_p1, %p1058_p0 }
 0x18b   : > { %p1056_p13 = pneg %p1055_p12 }
 0x18d   : > { %p1061_p3 = pnand %p1060_p2, %p1056_p13 }
 0x18f   : > { %1064 = shalt.err (!%p1061_p3)
}
 0x190   : > { %s1452_s13 = scalar_lea.sflag [#allocation5], %s1335_s17 }
 0x191   : > { %910 = dma.vmem_to_hbm [thread:$0]  (%p1202_p4), %s1380_s29, 256, %s1386_s10, %s1452_s13, %s1126_s12, %s1126_s12, %s1127_s14  }
 0x192 PF: > { %p924_p5 = scmp.ge.s32.totalorder %s1119_s23, 2  ;;  %s668_s24 = sand.u32 1, %s1099_s18  }
 0x193   : > { %s669_s9 = scalar_lea.sflag [#allocation3], %s668_s24 }
 0x194   : > { %p915_p6 = pnand %p924_p5, %p1211_p8 }
 0x196   : > { %p916_p7 = pneg %p915_p6 }
 0x198   : > { %1090 = dma.done.wait (%p916_p7), %s669_s9, 256  }
 0x199   : > { %1092 = vsyncadd (%p916_p7), %s669_s9, 4294967040  ;;  %s1453_s28 = sadd.s32 4294967294, %s1119_s23  }
 0x19a   : > { %s677_s11 = sand.u32 1, %s1453_s28  }
 0x19b   : > { %s678_s16 = scalar_lea.sflag [#allocation5], %s677_s11 }
 0x19c   : > { %1094 = dma.done.wait (%p916_p7), %s678_s16, 512  }
 0x19d   : > { %1096 = vsyncadd (%p916_p7), %s678_s16, 4294966784  ;;  %s22_s23 = sadd.s32 1, %s1119_s23   ;;  %s1454_s18 = smov %s1103_s19 }
 0x19e   : > { %p19_p4 = scmp.ge.s32.totalorder %s22_s23, 4   ;;  %s1455_s19 = smov %s1107_s20 }
 0x19f   : > { %s1456_s20 = smov %s1217_s6  ;;  %s1457_s21 = smov %s1115_s22 }
 0x1a0   : > { %s1458_s22 = smov %s1460_s26  ;;  %21 = sbr.rel (!%p19_p4) target bundleno = 6 (0x6), region = 114 }
 0x1a5   :  { %692 = vsyncpa [#allocation3], 1 }
 0x1a6   :  { %694 = vsyncpa [#allocation3 + $0x1], 1 }
 0x1a7   :  { %695 = vsyncpa [#allocation5], 1 }
 0x1a8   :  { %697 = vsyncpa [#allocation5 + $0x1], 1 }

</bundles_post_ra>
